<compile_context>
chip_gen: v7x
topology: tpu7x:2x2x1
jax: 0.10.0
libtpu: 0.0.40
codegen_flags: <defaults>
</compile_context>

<pallas_src>
import numpy as np

import jax
import jax.numpy as jnp
from jax.experimental import pallas as pl
from jax.experimental.pallas import tpu as pltpu


def _round_up(x, m):
    return ((x + m - 1) // m) * m


def _conv_relu_kernel(x_hbm, w_ref, b_ref, o_ref, buf, sem):
    # x_hbm: (N, C_in, L_pad)            raw HBM ref (pl.ANY), windows DMA'd manually
    # w_ref: (K, C_out, C_in)            resident weights (VMEM)
    # b_ref: (C_out, 1)                  resident bias (f32, VMEM)
    # o_ref: (1, C_out, tile_l)          lane-dense output block (length last)
    # buf:   (2, C_in, win)              double-buffered input window scratch
    # sem:   DMA semaphores, shape (2,)
    K = w_ref.shape[0]
    tl = o_ref.shape[2]
    win = buf.shape[2]

    n = pl.program_id(0)
    j = pl.program_id(1)
    n_tiles = pl.num_programs(1)

    def window_copy(jj, slot):
        start = pl.multiple_of(jj * tl, 128)
        return pltpu.make_async_copy(
            x_hbm.at[n, :, pl.ds(start, win)], buf.at[slot], sem.at[slot])

    # Prime the pipeline at the first tile of each batch row.
    @pl.when(j == 0)
    def _():
        window_copy(j, 0).start()

    slot = j % 2

    # Prefetch the next window (same batch row) while we compute this one.
    @pl.when(j + 1 < n_tiles)
    def _():
        window_copy(j + 1, 1 - slot).start()

    # Wait for the current window.
    window_copy(j, slot).wait()

    xwin = buf[slot]                                   # (C_in, win)
    # K is tiny (e.g. 3): static unroll of shifted matmuls, f32 accumulation.
    acc = jnp.dot(w_ref[0], xwin[:, 0:tl], preferred_element_type=jnp.float32)
    for k in range(1, K):
        acc = acc + jnp.dot(w_ref[k], xwin[:, k:k + tl],
                            preferred_element_type=jnp.float32)
    acc = acc + b_ref[...]                             # (C_out, 1) broadcast over lanes
    # Dropout == identity in eval mode; ReLU:
    o_ref[0] = jnp.maximum(acc, 0.0).astype(o_ref.dtype)


def conv_drop_relu(x, weight, bias, kernel_size, groups=1, *, tile_l=32768,
                   compute_dtype=None, out_dtype=None, xla_fallback_below=0):
    """x: (N, C_in, L); weight: (C_out, C_in, K); bias: (C_out,). Returns (N, C_out, L)."""
    N, C_in, L = x.shape
    C_out, C_in_w, K = weight.shape
    assert K == kernel_size and C_in_w == C_in
    if groups != 1:
        raise NotImplementedError("groups > 1 not supported")  # TODO(synk): grouped conv
    assert K - 1 <= 128, "halo must fit in the 128-lane alignment pad"

    cdt = jnp.dtype(x.dtype) if compute_dtype is None else jnp.dtype(compute_dtype)
    odt = jnp.dtype(x.dtype) if out_dtype is None else jnp.dtype(out_dtype)

    # ZeroPad2d((left, right, 0, 0)) == pad the length axis only ("same" output).
    left = kernel_size // 2
    right = kernel_size // 2 - (1 if kernel_size % 2 == 0 else 0)

    # Tiny problems: plain XLA conv is faster than any Pallas launch overhead.
    # (Disabled by default here so the Pallas path is exercised.)
    if xla_fallback_below and N * L * C_out < xla_fallback_below:
        y = jax.lax.conv_general_dilated(
            x.astype(cdt), weight.astype(cdt), window_strides=(1,),
            padding=[(left, right)], dimension_numbers=("NCH", "OIH", "NCH"))
        return jnp.maximum(y + bias.astype(cdt)[None, :, None], 0.0).astype(odt)

    # --- choose a lane-dense length tile (multiple of 128, <= requested tile_l) ---
    L128 = _round_up(L, 128)
    tl = min(_round_up(tile_l, 128), L128)
    n_tiles = pl.cdiv(L, tl)
    tl = _round_up(-(-L // n_tiles), 128)     # rebalance so the last tile isn't mostly waste
    L_t = n_tiles * tl                        # padded logical output length
    win = tl + 128                            # lane-aligned input window (>= tl + K - 1)

    # Single prep pass over x: cast to compute dtype, then pad length so every
    # window [j*tl, j*tl + win) is in-bounds (includes the conv's zero padding).
    total_in = (n_tiles - 1) * tl + win
    pad_right = total_in - left - L
    x_pad = jnp.pad(x.astype(cdt), ((0, 0), (0, 0), (left, pad_right)))

    w_kcc = jnp.transpose(weight, (2, 0, 1)).astype(cdt)   # (K, C_out, C_in)
    b2d = bias.reshape(C_out, 1).astype(jnp.float32)

    bytes_accessed = (x_pad.size * np.dtype(cdt).itemsize
                      + w_kcc.size * np.dtype(cdt).itemsize
                      + N * C_out * L_t * np.dtype(odt).itemsize)
    cost = pl.CostEstimate(flops=2 * N * C_out * C_in * K * L_t,
                           transcendentals=0, bytes_accessed=bytes_accessed)

    out = pl.pallas_call(
        _conv_relu_kernel,
        out_shape=jax.ShapeDtypeStruct((N, C_out, L_t), odt),
        grid=(N, n_tiles),
        in_specs=[
            pl.BlockSpec(memory_space=pl.ANY),                      # x stays in HBM
            pl.BlockSpec((K, C_out, C_in), lambda n, j: (0, 0, 0)),  # resident weights
            pl.BlockSpec((C_out, 1), lambda n, j: (0, 0)),           # resident bias
        ],
        out_specs=pl.BlockSpec((1, C_out, tl), lambda n, j: (n, 0, j)),
        scratch_shapes=[
            pltpu.VMEM((2, C_in, win), cdt),        # double-buffered input windows
            pltpu.SemaphoreType.DMA((2,)),
        ],
        compiler_params=pltpu.CompilerParams(
            dimension_semantics=("parallel", "arbitrary")),
        cost_estimate=cost,
    )(x_pad, w_kcc, b2d)

    return out[:, :, :L]


if __name__ == "__main__":
    # Module hyperparameters (consistent with the PyTorch module).
    in_channels, out_channels, kernel_size, dropout, groups = 4, 8, 3, 0.1, 1

    def ref_conv_relu(x, weight, bias):
        left = kernel_size // 2
        right = kernel_size // 2 - (1 if kernel_size % 2 == 0 else 0)
        y = jax.lax.conv_general_dilated(
            x, weight, window_strides=(1,), padding=[(left, right)],
            dimension_numbers=("NCH", "OIH", "NCH"))
        return jnp.maximum(y + bias[None, :, None], 0.0)  # eval-mode dropout == identity

    key = jax.random.PRNGKey(0)
    kx, kw, kb, kx2 = jax.random.split(key, 4)

    weight = jax.random.normal(kw, (out_channels, in_channels, kernel_size),
                               dtype=jnp.float32) * 0.1
    bias = jax.random.normal(kb, (out_channels,), dtype=jnp.float32) * 0.1

    # --- small single-tile case ---
    N, L = 2, 16
    x = jax.random.normal(kx, (N, in_channels, L), dtype=jnp.float32)
    out = jax.block_until_ready(
        conv_drop_relu(x, weight, bias, kernel_size, groups=groups))
    ref = ref_conv_relu(x, weight, bias)
    assert out.shape == (N, out_channels, L)
    assert jnp.allclose(out, ref, atol=1e-5, rtol=1e-5)

    # --- multi-tile case: exercises the double-buffered window DMA and halos ---
    L2 = 300
    x2 = jax.random.normal(kx2, (N, in_channels, L2), dtype=jnp.float32)
    out2 = jax.block_until_ready(
        conv_drop_relu(x2, weight, bias, kernel_size, groups=groups, tile_l=128))
    ref2 = ref_conv_relu(x2, weight, bias)
    assert out2.shape == (N, out_channels, L2)
    assert jnp.allclose(out2, ref2, atol=1e-5, rtol=1e-5)

    # --- bf16 compute + bf16 output path (halves HBM traffic; valid on v5e/v6e/v7x) ---
    out_bf16 = jax.block_until_ready(
        conv_drop_relu(x2, weight, bias, kernel_size, groups=groups, tile_l=128,
                       compute_dtype=jnp.bfloat16, out_dtype=jnp.bfloat16))
    assert jnp.allclose(out_bf16.astype(jnp.float32), ref2, atol=5e-2, rtol=5e-2)

    print("KERNEL_OK")
</pallas_src>

<mosaic_0001>
module attributes {stable_mosaic.version = 11 : i64} {
  func.func @_conv_relu_kernel(%arg0: i32, %arg1: i32, %arg2: memref<2x4x256xf32, #tpu.memory_space<any>>, %arg3: memref<3x8x4xf32, #tpu.memory_space<vmem>>, %arg4: memref<8x1xf32, #tpu.memory_space<vmem>>, %arg5: memref<1x8x128xf32, #tpu.memory_space<vmem>>, %arg6: memref<2x4x256xf32, #tpu.memory_space<vmem>>, %arg7: memref<2x!tpu.dma_semaphore, #tpu.memory_space<semaphore_mem>>) attributes {dimension_semantics = [#tpu.dimension_semantics<parallel>, #tpu.dimension_semantics<arbitrary>], iteration_bounds = array<i64: 2, 1>, scalar_prefetch = 0 : i64, scratch_operands = 2 : i64, tpu.core_type = #tpu.core_type<tc>, window_params = [{}, {pipeline_mode = #tpu.pipeline_mode<synchronous>, transform_indices = @transform_1, window_bounds = array<i64: 3, 8, 4>}, {pipeline_mode = #tpu.pipeline_mode<synchronous>, transform_indices = @transform_2, window_bounds = array<i64: 8, 1>}, {transform_indices = @transform_3, window_bounds = array<i64: 1, 8, 128>}]} {
    %c0_i32 = arith.constant 0 : i32
    %0 = arith.cmpi eq, %arg1, %c0_i32 : i32
    %1 = arith.extui %0 : i1 to i32
    %c0_i32_0 = arith.constant 0 : i32
    %2 = arith.cmpi ne, %1, %c0_i32_0 : i32
    scf.if %2 {
      %c128_i32_27 = arith.constant 128 : i32
      %50 = arith.muli %arg1, %c128_i32_27 : i32
      %51 = tpu.assume_multiple %50, 128 : i32
      %c0_i32_28 = arith.constant 0 : i32
      %c0_i32_29 = arith.constant 0 : i32
      %c0_i32_30 = arith.constant 0 : i32
      %52 = tpu.memref_slice %arg2[%arg0, %c0_i32_30, %51] : memref<2x4x256xf32, #tpu.memory_space<any>> -> memref<1x4x256xf32, #tpu.memory_space<any>>
      %53 = tpu.memref_squeeze %52 : memref<1x4x256xf32, #tpu.memory_space<any>> -> memref<4x256xf32, #tpu.memory_space<any>>
      %c0_i32_31 = arith.constant 0 : i32
      %c0_i32_32 = arith.constant 0 : i32
      %54 = tpu.memref_slice %arg6[%c0_i32_28, %c0_i32_31, %c0_i32_32] : memref<2x4x256xf32, #tpu.memory_space<vmem>> -> memref<1x4x256xf32, #tpu.memory_space<vmem>>
      %55 = tpu.memref_squeeze %54 : memref<1x4x256xf32, #tpu.memory_space<vmem>> -> memref<4x256xf32, #tpu.memory_space<vmem>>
      %56 = tpu.memref_slice %arg7[%c0_i32_29] : memref<2x!tpu.dma_semaphore, #tpu.memory_space<semaphore_mem>> -> memref<1x!tpu.dma_semaphore, #tpu.memory_space<semaphore_mem>>
      %57 = tpu.memref_squeeze %56 : memref<1x!tpu.dma_semaphore, #tpu.memory_space<semaphore_mem>> -> memref<!tpu.dma_semaphore, #tpu.memory_space<semaphore_mem>>
      tpu.enqueue_dma source(%53 : memref<4x256xf32, #tpu.memory_space<any>>) target(%55 : memref<4x256xf32, #tpu.memory_space<vmem>>) target_semaphore(%57 : memref<!tpu.dma_semaphore, #tpu.memory_space<semaphore_mem>>)
    } else {
    }
    %c2_i32 = arith.constant 2 : i32
    %c0_i32_1 = arith.constant 0 : i32
    %3 = arith.cmpi eq, %c2_i32, %c0_i32_1 : i32
    %c1_i32 = arith.constant 1 : i32
    %4 = arith.select %3, %c1_i32, %c2_i32 : i32
    %5 = arith.remsi %arg1, %4 : i32
    %c0_i32_2 = arith.constant 0 : i32
    %6 = arith.cmpi ne, %5, %c0_i32_2 : i32
    %c0_i32_3 = arith.constant 0 : i32
    %7 = arith.cmpi slt, %5, %c0_i32_3 : i32
    %c0_i32_4 = arith.constant 0 : i32
    %8 = arith.cmpi slt, %4, %c0_i32_4 : i32
    %9 = arith.xori %7, %8 : i1
    %10 = arith.andi %9, %6 : i1
    %11 = arith.addi %5, %4 : i32
    %12 = arith.select %10, %11, %5 : i32
    %c1_i32_5 = arith.constant 1 : i32
    %13 = arith.addi %arg1, %c1_i32_5 : i32
    %c1_i32_6 = arith.constant 1 : i32
    %14 = arith.cmpi slt, %13, %c1_i32_6 : i32
    %15 = arith.extui %14 : i1 to i32
    %c0_i32_7 = arith.constant 0 : i32
    %16 = arith.cmpi ne, %15, %c0_i32_7 : i32
    scf.if %16 {
      %c1_i32_27 = arith.constant 1 : i32
      %50 = arith.addi %arg1, %c1_i32_27 : i32
      %c1_i32_28 = arith.constant 1 : i32
      %51 = arith.subi %c1_i32_28, %12 : i32
      %c128_i32_29 = arith.constant 128 : i32
      %52 = arith.muli %50, %c128_i32_29 : i32
      %53 = tpu.assume_multiple %52, 128 : i32
      %c0_i32_30 = arith.constant 0 : i32
      %54 = tpu.memref_slice %arg2[%arg0, %c0_i32_30, %53] : memref<2x4x256xf32, #tpu.memory_space<any>> -> memref<1x4x256xf32, #tpu.memory_space<any>>
      %55 = tpu.memref_squeeze %54 : memref<1x4x256xf32, #tpu.memory_space<any>> -> memref<4x256xf32, #tpu.memory_space<any>>
      %c0_i32_31 = arith.constant 0 : i32
      %c0_i32_32 = arith.constant 0 : i32
      %56 = tpu.memref_slice %arg6[%51, %c0_i32_31, %c0_i32_32] : memref<2x4x256xf32, #tpu.memory_space<vmem>> -> memref<1x4x256xf32, #tpu.memory_space<vmem>>
      %57 = tpu.memref_squeeze %56 : memref<1x4x256xf32, #tpu.memory_space<vmem>> -> memref<4x256xf32, #tpu.memory_space<vmem>>
      %58 = tpu.memref_slice %arg7[%51] : memref<2x!tpu.dma_semaphore, #tpu.memory_space<semaphore_mem>> -> memref<1x!tpu.dma_semaphore, #tpu.memory_space<semaphore_mem>>
      %59 = tpu.memref_squeeze %58 : memref<1x!tpu.dma_semaphore, #tpu.memory_space<semaphore_mem>> -> memref<!tpu.dma_semaphore, #tpu.memory_space<semaphore_mem>>
      tpu.enqueue_dma source(%55 : memref<4x256xf32, #tpu.memory_space<any>>) target(%57 : memref<4x256xf32, #tpu.memory_space<vmem>>) target_semaphore(%59 : memref<!tpu.dma_semaphore, #tpu.memory_space<semaphore_mem>>)
    } else {
    }
    %c128_i32 = arith.constant 128 : i32
    %17 = arith.muli %arg1, %c128_i32 : i32
    %18 = tpu.assume_multiple %17, 128 : i32
    %c0_i32_8 = arith.constant 0 : i32
    %19 = tpu.memref_slice %arg2[%arg0, %c0_i32_8, %18] : memref<2x4x256xf32, #tpu.memory_space<any>> -> memref<1x4x256xf32, #tpu.memory_space<any>>
    %20 = tpu.memref_squeeze %19 : memref<1x4x256xf32, #tpu.memory_space<any>> -> memref<4x256xf32, #tpu.memory_space<any>>
    %c0_i32_9 = arith.constant 0 : i32
    %c0_i32_10 = arith.constant 0 : i32
    %21 = tpu.memref_slice %arg6[%12, %c0_i32_9, %c0_i32_10] : memref<2x4x256xf32, #tpu.memory_space<vmem>> -> memref<1x4x256xf32, #tpu.memory_space<vmem>>
    %22 = tpu.memref_squeeze %21 : memref<1x4x256xf32, #tpu.memory_space<vmem>> -> memref<4x256xf32, #tpu.memory_space<vmem>>
    %23 = tpu.memref_slice %arg7[%12] : memref<2x!tpu.dma_semaphore, #tpu.memory_space<semaphore_mem>> -> memref<1x!tpu.dma_semaphore, #tpu.memory_space<semaphore_mem>>
    %24 = tpu.memref_squeeze %23 : memref<1x!tpu.dma_semaphore, #tpu.memory_space<semaphore_mem>> -> memref<!tpu.dma_semaphore, #tpu.memory_space<semaphore_mem>>
    tpu.wait_dma2 semaphore(%24 : memref<!tpu.dma_semaphore, #tpu.memory_space<semaphore_mem>>) src(%20 : memref<4x256xf32, #tpu.memory_space<any>>) dst(%22 : memref<4x256xf32, #tpu.memory_space<vmem>>)
    %25 = arith.index_cast %12 : i32 to index
    %c0 = arith.constant 0 : index
    %c0_11 = arith.constant 0 : index
    %26 = vector.load %arg6[%25, %c0, %c0_11] : memref<2x4x256xf32, #tpu.memory_space<vmem>>, vector<1x4x256xf32>
    %27 = vector.shape_cast %26 : vector<1x4x256xf32> to vector<4x256xf32>
    %c0_12 = arith.constant 0 : index
    %c0_13 = arith.constant 0 : index
    %c0_14 = arith.constant 0 : index
    %28 = vector.load %arg3[%c0_12, %c0_13, %c0_14] : memref<3x8x4xf32, #tpu.memory_space<vmem>>, vector<1x8x4xf32>
    %29 = vector.shape_cast %28 : vector<1x8x4xf32> to vector<8x4xf32>
    %30 = vector.extract_strided_slice %27 {offsets = [0, 0], sizes = [4, 128], strides = [1, 1]} : vector<4x256xf32> to vector<4x128xf32>
    %cst = arith.constant dense<0.000000e+00> : vector<8x128xf32>
    %31 = tpu.matmul %29, %30, %cst {dimension_numbers = #tpu.dot_dimension_numbers<[1], [0], [0], [1], [0, 0, 1, 1], [], []>} : vector<8x4xf32>, vector<4x128xf32>, vector<8x128xf32> -> vector<8x128xf32>
    %c1 = arith.constant 1 : index
    %c0_15 = arith.constant 0 : index
    %c0_16 = arith.constant 0 : index
    %32 = vector.load %arg3[%c1, %c0_15, %c0_16] : memref<3x8x4xf32, #tpu.memory_space<vmem>>, vector<1x8x4xf32>
    %33 = vector.shape_cast %32 : vector<1x8x4xf32> to vector<8x4xf32>
    %34 = vector.extract_strided_slice %27 {offsets = [0, 1], sizes = [4, 128], strides = [1, 1]} : vector<4x256xf32> to vector<4x128xf32>
    %cst_17 = arith.constant dense<0.000000e+00> : vector<8x128xf32>
    %35 = tpu.matmul %33, %34, %cst_17 {dimension_numbers = #tpu.dot_dimension_numbers<[1], [0], [0], [1], [0, 0, 1, 1], [], []>} : vector<8x4xf32>, vector<4x128xf32>, vector<8x128xf32> -> vector<8x128xf32>
    %36 = arith.addf %31, %35 : vector<8x128xf32>
    %c2 = arith.constant 2 : index
    %c0_18 = arith.constant 0 : index
    %c0_19 = arith.constant 0 : index
    %37 = vector.load %arg3[%c2, %c0_18, %c0_19] : memref<3x8x4xf32, #tpu.memory_space<vmem>>, vector<1x8x4xf32>
    %38 = vector.shape_cast %37 : vector<1x8x4xf32> to vector<8x4xf32>
    %39 = vector.extract_strided_slice %27 {offsets = [0, 2], sizes = [4, 128], strides = [1, 1]} : vector<4x256xf32> to vector<4x128xf32>
    %cst_20 = arith.constant dense<0.000000e+00> : vector<8x128xf32>
    %40 = tpu.matmul %38, %39, %cst_20 {dimension_numbers = #tpu.dot_dimension_numbers<[1], [0], [0], [1], [0, 0, 1, 1], [], []>} : vector<8x4xf32>, vector<4x128xf32>, vector<8x128xf32> -> vector<8x128xf32>
    %41 = arith.addf %36, %40 : vector<8x128xf32>
    %c0_21 = arith.constant 0 : index
    %c0_22 = arith.constant 0 : index
    %42 = vector.load %arg4[%c0_21, %c0_22] : memref<8x1xf32, #tpu.memory_space<vmem>>, vector<8x1xf32>
    %43 = vector.broadcast %42 : vector<8x1xf32> to vector<8x128xf32>
    %44 = arith.addf %41, %43 : vector<8x128xf32>
    %cst_23 = arith.constant 0.000000e+00 : f32
    %45 = vector.broadcast %cst_23 : f32 to vector<8x128xf32>
    %46 = arith.maximumf %44, %45 : vector<8x128xf32>
    %c0_24 = arith.constant 0 : index
    %c0_25 = arith.constant 0 : index
    %c0_26 = arith.constant 0 : index
    %47 = vector.load %arg5[%c0_24, %c0_25, %c0_26] : memref<1x8x128xf32, #tpu.memory_space<vmem>>, vector<1x8x128xf32>
    %48 = vector.shape_cast %47 : vector<1x8x128xf32> to vector<8x128xf32>
    %49 = vector.shape_cast %46 : vector<8x128xf32> to vector<1x8x128xf32>
    tpu.vector_store %arg5[%c0_24, %c0_25, %c0_26], %49 {strides = array<i32>} : memref<1x8x128xf32, #tpu.memory_space<vmem>>, vector<1x8x128xf32>,
    return
  }
  func.func @transform_1(%arg0: i32, %arg1: i32) -> (i32, i32, i32) {
    %c0_i32 = arith.constant 0 : i32
    %c0_i32_0 = arith.constant 0 : i32
    %c0_i32_1 = arith.constant 0 : i32
    %c0_i32_2 = arith.constant 0 : i32
    return %c0_i32, %c0_i32_0, %c0_i32_1 : i32, i32, i32
  }
  func.func @transform_2(%arg0: i32, %arg1: i32) -> (i32, i32) {
    %c0_i32 = arith.constant 0 : i32
    %c0_i32_0 = arith.constant 0 : i32
    %c0_i32_1 = arith.constant 0 : i32
    return %c0_i32, %c0_i32_0 : i32, i32
  }
  func.func @transform_3(%arg0: i32, %arg1: i32) -> (i32, i32, i32) {
    %c0_i32 = arith.constant 0 : i32
    %c0_i32_0 = arith.constant 0 : i32
    return %arg0, %c0_i32, %arg1 : i32, i32, i32
  }
}

</mosaic_0001>

<bundles_post_ra>
// kernel: tpu_custom_call.1
= control target key start
LH: loop header
LB: loop body
LE: loop exit
PB: predicated region body
PF: predicated region fallthrough
CT: control target
= control target key end

     0   :  { %8 = vsyncpa [#allocation5], 0  ;;  %s1002_s0 = inlined_call_operand.vmem [shape: f32[2,4,256], index: 0, kind: input, shape index: {}]   ;;  %s1003_s1 = inlined_call_operand.vmem [shape: f32[3,8,4], index: 1, kind: input, shape index: {}]   ;;  %s1004_s2 = inlined_call_operand.vmem [shape: f32[8,1], index: 2, kind: input, shape index: {}]   ;;  %s1005_s3 = inlined_call_operand.hbm [shape: f32[2,8,128], index: 3, kind: output, shape index: {}]  }
   0x1   :  { %10 = vsyncpa [#allocation5 + $0x1], 0  ;;  %s859_s12 = smov 0   ;;  %s861_s13 = smov 0  }
   0x2   :  { %s863_s14 = smov 0   ;;  %s865_s15 = smov 0  }
   0x3   :  { %s867_s16 = smov 0   ;;  %s869_s17 = smov 0  }
   0x4 LB: > { %s641_s18 = sadd.s32 4294967295, %s831_s17   ;;  %s642_s19 = sadd.s32 4294967294, %s831_s17   ;;  %s831_s17 = sphi %s869_s17, %s16_s17   ;;  %s827_s16 = sphi %s867_s16, %s1012_s16   ;;  %s823_s15 = sphi %s865_s15, %s1011_s15   ;;  %s819_s14 = sphi %s863_s14, %s1010_s14   ;;  %s815_s13 = sphi %s861_s13, %s1009_s13   ;;  %s811_s12 = sphi %s859_s12, %s1008_s12  }
   0x5   : > { %s28_s20 = sadd.s32 1, %s827_s16  ;;  %s79_s21 = sadd.s32 1, %s819_s14 }
   0x6   : > { %p30_p0 = scmp.ge.s32.totalorder %s28_s20, 2  ;;  %p89_p1 = scmp.ne.s32.totalorder %s819_s14, %s815_s13 }
   0x7   : > { %p90_p2 = scmp.eq.s32.totalorder %s641_s18, 1  ;;  %p95_p3 = scmp.ne.s32.totalorder %s815_s13, %s811_s12 }
   0x8   : > { %s1014_s20 = smov (%p30_p0, %s28_s20), 0  ;;  %p96_p5 = scmp.eq.s32.totalorder %s642_s19, 1 }
   0x9   : > { %p899_p4 = por %p90_p2, %p89_p1  ;;  %s74_s23 = ssub.s32 %s827_s16, %s1014_s20 }
   0xa   : > { %p644_p6 = scmp.ge.s32.totalorder %s831_s17, 1  ;;  %p77_p7 = scmp.eq.s32.totalorder %s74_s23, 0 }
   0xb   : > { %p906_p8 = por %p96_p5, %p95_p3  ;;  %p120_p9 = scmp.lt.s32.totalorder %s831_s17, 3 }
   0xc   : > { %s912_s25 = scalar_select %p77_p7, %s819_s14, %s79_s21  }
   0xd   : > { %p121_p10 = pnand %p644_p6, %p120_p9 }
   0xe   : > { %s134_s26 = sand.u32 (!%p121_p10), 1, %s815_s13   ;;  %s666_s27 = sshll.u32 (!%p121_p10), %s823_s15, 3 }
   0xf   : > { %124 = sbr.rel (%p121_p10) target bundleno = 382 (0x17e), region = 28  ;;  %s918_s28 = sshll.u32 (!%p121_p10), %s134_s26, 3 }
  0x10   : > { %s147_s4 = scalar_lea.vmem (!%p121_p10), %s1002_s0, %s666_s27  ;;  %s136_s5 = scalar_lea.vmem (!%p121_p10), [#allocation4], %s918_s28 }
  0x11   : > { %v180_v0 = vld [vmem:[%s147_s4] sm:$0xff] (!%p121_p10) }
  0x16   : > { %189 = vsyncadd [#allocation3], 128 }
  0x17   : > { %803 = dma.done.wait [#allocation3], 128 }
  0x18   : > { %804 = vsyncadd [#allocation3], 4294967168  ;;  %s833_s6 = smov 126   ;;  %s834_s7 = smov 127   ;;  %v275_v1 = vcombine.high %v180_v0, %v180_v0  ;;  %vm286_vm0 = vcmask 1043456   ;;  %v835_v2 = vmov 0.0  }
  0x19   : > { %436 = vrot.lane.b32.xlu1 %v180_v0, %s833_s6  ;;  %276 = vrot.lane.b32.xlu0 %v180_v0, %s834_s7  ;;  %vm836_vm1 = vmmov 0   ;;  %v837_v3 = vmov 0   ;;  %vm282_vm2 = vcmask 31744   ;;  %v271_v4 = vld [vmem:[%s1003_s1] sm:$0xff]  ;;  %vm280_vm3 = vcmask 1039360   ;;  %v652_v10 = vld [vmem:[%s1003_s1 + $0x8] sm:$0xff] }
  0x1a   : > { %675 = vmatprep.subr.mxu0 %v835_v2  ;;  %677 = vmatprep.mubr.msk.f32.mxu0 %vm836_vm1, %v835_v2  ;;  %v518_v5 = vld [vmem:[%s1004_s2] sm:$0xff]  ;;  %vm440_vm4 = vcmask 1031168   ;;  %v657_v13 = vld [vmem:[%s1003_s1 + $0x10] sm:$0xff]  ;;  %s661_s27 = sshll.u32 %s823_s15, 7  ;;  %s542_s29 = sshll.u32 %s136_s5, 4  ;;  %s953_s29 = int_to_ptr.vmem [resolvable:$true] %s542_s29 }
  0x1b   : > { %680 = vmatprep.subr.mxu1 %v835_v2  ;;  %682 = vmatprep.mubr.msk.f32.mxu1 %vm836_vm1, %v835_v2  ;;  %s751_s8 = scalar_lea.vmem %s953_s29, 128  ;;  %s838_s15 = smov [#allocation4]  }
  0x1c   : > { %681 = vmatpush3.msk.msra.mxu1 %vm286_vm0, %v180_v0  ;;  %750 = vset.pattern.permute.xlu0 %v837_v3  ;;  %p752_p11 = scmp.ne.s32.totalorder %s953_s29, %s751_s8  ;;  %s755_s9 = sshll.u32 %s838_s15, 4  ;;  %s756_s9 = int_to_ptr.vmem [resolvable:$false] %s755_s9 }
  0x1d   : > { %438 = vrot.lane.b32.xlu1 %v275_v1, %s833_s6  ;;  %278 = vrot.lane.b32.xlu0 %v275_v1, %s834_s7  ;;  %s951_s6 = scalar_lea.hbm %s1005_s3, %s661_s27  ;;  %s528_s7 = scalar_lea.sflag [#allocation5], %s134_s26 }
  0x1e   : > { %683 = vmatmul.mubr.msk.f32.vlgmr.msra.gmra.mrb[0].mxu1 %vm282_vm2, %v271_v4  ;;  %p753_p12 = pnand %p752_p11, %p899_p4  ;;  %s757_s10 = scalar_lea.vmem %s756_s9, 256 }
  0x1f   : > { %p758_p0 = scmp.lt.s32.totalorder %s953_s29, %s756_s9  ;;  %p759_p1 = scmp.lt.s32.totalorder %s757_s10, %s751_s8 }
  0x20   : > { %p754_p13 = pneg %p753_p12 }
  0x21   : > { %521 = vperm.xlu0 %750, %v518_v5   ;;  %p760_p2 = por %p759_p1, %p758_p0 }
  0x23   : > { %p761_p3 = pnand %p760_p2, %p754_p13 }
  0x8b   : > { %v437_v6 = vpop.permute.xlu1 %436  ;;  %v277_v7 = vpop.permute.xlu0 %276 }
  0x8f   : > { %v439_v8 = vpop.permute.xlu1 %438  ;;  %v279_v9 = vpop.permute.xlu0 %278 }
  0x90   : > { %v281_v11 = vsel %vm280_vm3, %v277_v7, %v279_v9  ;;  %v441_v12 = vsel %vm440_vm4, %v437_v6, %v439_v8 }
  0x91   : > { %676 = vmatpush3.msk.msra.mxu0 %vm286_vm0, %v281_v11 }
  0x92   : > { %678 = vmatmul.mubr.msk.f32.vlgmr.msra.gmra.mrb[0].mxu0 %vm282_vm2, %v652_v10  ;;  %685 = vmatprep.subr.mxu0 %v835_v2 }
  0x93   : > { %686 = vmatpush3.msk.msra.mxu0 %vm286_vm0, %v441_v12  ;;  %687 = vmatprep.mubr.msk.f32.mxu0 %vm836_vm1, %v835_v2 }
  0x96   : > { %688 = vmatmul.mubr.msk.f32.vlgmr.msra.gmra.mrb[2].mxu0 %vm282_vm2, %v657_v13 }
  0xa0   : > { %v522_v20 = vpop.permute.xlu0 %521 }
  0xf1   : > { %v430_v14 = vpop.f32.mrb[0].mxu1 }
  0xf2   : > { %v684_v15 = vpop.f32.mrb[1].mxu1 }
 0x165   : > { %v355_v16 = vpop.f32.mrb[0].mxu0 }
 0x166   : > { %v679_v17 = vpop.f32.mrb[1].mxu0  ;;  %v431_v18 = vadd.f32 %v430_v14, %v355_v16 }
 0x169   : > { %v513_v19 = vpop.f32.mrb[2].mxu0 }
 0x16a   : > { %v517_v21 = vadd.f32 %v513_v19, %v431_v18  ;;  %v689_v22 = vpop.f32.mrb[3].mxu0 }
 0x16c   : > { %v524_v23 = vadd.f32 %v522_v20, %v517_v21 }
 0x16e   : > { %v525_v24 = vmax.f32 %v524_v23, 0.0 }
 0x170   : > { %526 = vst [vmem:[%s136_s5] sm:$0xff] %v525_v24 }
 0x171   : > { %764 = shalt.err (!%p761_p3)
}
 0x172   : > { %s765_s26 = scalar_lea.hbm %s951_s6, 128  ;;  %s769_s11 = scalar_lea.hbm %s1005_s3, 256 }
 0x173   : > { %p766_p5 = scmp.ne.s32.totalorder %s951_s6, %s765_s26  ;;  %p770_p9 = scmp.lt.u32.totalorder %s951_s6, %s1005_s3 }
 0x174   : > { %p771_p10 = scmp.lt.u32.totalorder %s769_s11, %s765_s26  ;;  %p773_p12 = scmp.lt.u32.totalorder %s765_s26, %s951_s6 }
 0x175   : > { %p767_p6 = pnand %p766_p5, %p899_p4 }
 0x176   : > { %p772_p11 = por %p771_p10, %p770_p9 }
 0x177   : > { %p768_p7 = pneg %p767_p6 }
 0x178   : > { %p774_p13 = por %p773_p12, %p772_p11 }
 0x17a   : > { %p775_p0 = pnand %p774_p13, %p768_p7 }
 0x17c   : > { %778 = shalt.err (!%p775_p0)
}
 0x17d   : > { %690 = dma.vmem_to_hbm [thread:$0]  (%p899_p4), %s953_s29, 128, %s951_s6, %s528_s7  }
 0x17e PF: > { %p696_p1 = scmp.ge.s32.totalorder %s831_s17, 2  ;;  %s554_s21 = sand.u32 1, %s811_s12  }
 0x17f   : > { %s555_s23 = scalar_lea.sflag [#allocation5], %s554_s21 }
 0x180   : > { %p693_p2 = pnand %p696_p1, %p906_p8 }
 0x182   : > { %806 = dma.done.wait (!%p693_p2), %s555_s23, 128  }
 0x183   : > { %808 = vsyncadd (!%p693_p2), %s555_s23, 4294967168  ;;  %s16_s17 = sadd.s32 1, %s831_s17   ;;  %s1008_s12 = smov %s815_s13 }
 0x184   : > { %p13_p3 = scmp.ge.s32.totalorder %s16_s17, 4   ;;  %s1009_s13 = smov %s819_s14 }
 0x185   : > { %s1010_s14 = smov %s912_s25  ;;  %s1011_s15 = smov %s827_s16 }
 0x186   : > { %s1012_s16 = smov %s1014_s20  ;;  %15 = sbr.rel (!%p13_p3) target bundleno = 4 (0x4), region = 161 }
 0x18d   :  { %560 = vsyncpa [#allocation5], 1 }
 0x18e   :  { %562 = vsyncpa [#allocation5 + $0x1], 1 }
 0x18f   :  { %563 = vsyncmov [#allocation3] }
 0x192   :  { %s564_s22 = vpop.sfrf %563 }
 0x193   :  { %p664_p4 = scmp.ne.s32.totalorder %s564_s22, 0 }
 0x195   :  { %568 = shalt.err (%p664_p4)  }
 0x196   :  { %570 = vsyncmov [#allocation3 + $0x1] }
 0x199   :  { %s571_s24 = vpop.sfrf %570 }
 0x19a   :  { %p665_p8 = scmp.ne.s32.totalorder %s571_s24, 0 }
 0x19c   :  { %575 = shalt.err (%p665_p8)  }

</bundles_post_ra>
